<compile_context>
chip_gen: v7x
topology: tpu7x:2x2x1
jax: 0.10.0
libtpu: 0.0.40
codegen_flags: <defaults>
</compile_context>

<pallas_src>
import jax
import jax.numpy as jnp
from jax.experimental import pallas as pl
from jax.experimental.pallas import tpu as pltpu


def make_dueling_kernel(B, N, dim_in):
    # Static row offsets into the packed weight slab.  With dim_in % 8 == 0 all
    # offsets are multiples of 8, so every slice below is sublane-tile aligned.
    o_w1v = 0                       # (dim_in,128) value fc1 (cols 64: zero-pad)
    o_w2v = dim_in                  # (128,128)    value fc2 (rows 64: zero-pad)
    o_w3v = dim_in + 128            # (128,128)    value fc3
    o_uf = dim_in + 256             # (dim_in,128) advantage fc1, user-feature half
    o_tf = 2 * dim_in + 256         # (dim_in,128) advantage fc1, target-feature half
    o_w2a = 3 * dim_in + 256        # (128,128)    advantage fc2
    o_w3a = 3 * dim_in + 384        # (128,128)    advantage fc3

    def kernel(obs_ref, tf_ref, w_ref, b_ref, q_ref):
        obs = obs_ref[...]          # (B, dim_in)
        tf = tf_ref[...]            # (B*N, dim_in)

        # ---- ValueNet on the B unique observation rows (no per-target replication)
        h = jnp.dot(obs, w_ref[o_w1v:o_w1v + dim_in, :],
                    preferred_element_type=jnp.float32) + b_ref[0:1, :]
        h = jnp.maximum(h, 0.0)                               # (B,128); lanes 64: stay 0
        h = jnp.dot(h, w_ref[o_w2v:o_w2v + 128, :],
                    preferred_element_type=jnp.float32) + b_ref[1:2, :]
        h = jnp.maximum(h, 0.0)
        v = jnp.dot(h, w_ref[o_w3v:o_w3v + 128, :],
                    preferred_element_type=jnp.float32) + b_ref[2:3, :]    # (B,128)

        # ---- AdvantageNet fc1, fused concat: user half on B rows, target half on B*N rows
        obs_proj = jnp.dot(obs, w_ref[o_uf:o_uf + dim_in, :],
                           preferred_element_type=jnp.float32)             # (B,128)
        tf_proj = jnp.dot(tf, w_ref[o_tf:o_tf + dim_in, :],
                          preferred_element_type=jnp.float32) + b_ref[3:4, :]  # (B*N,128)
        h = tf_proj.reshape(B, N, 128) + obs_proj[:, None, :]              # per-batch broadcast
        h = jnp.maximum(h, 0.0).reshape(B * N, 128)
        h = jnp.dot(h, w_ref[o_w2a:o_w2a + 128, :],
                    preferred_element_type=jnp.float32) + b_ref[4:5, :]
        h = jnp.maximum(h, 0.0)
        a = jnp.dot(h, w_ref[o_w3a:o_w3a + 128, :],
                    preferred_element_type=jnp.float32) + b_ref[5:6, :]    # (B*N,128)

        # ---- inner(a, v): per-(b,n) dot with the per-batch value vector
        q_ref[...] = jnp.sum(a.reshape(B, N, 128) * v[:, None, :], axis=2)  # (B,N)

    return kernel


def init_params(key, dim_in):
    """Deterministic init mimicking torch.nn.Linear: U(-1/sqrt(fan_in), 1/sqrt(fan_in)).
    Weights stored as (in, out); biases as (1, out). Raw (unpacked) layout."""
    def linear(key, fan_in, fan_out):
        kw, kb = jax.random.split(key)
        bound = 1.0 / jnp.sqrt(fan_in)
        w = jax.random.uniform(kw, (fan_in, fan_out), jnp.float32, -bound, bound)
        b = jax.random.uniform(kb, (1, fan_out), jnp.float32, -bound, bound)
        return w, b

    keys = jax.random.split(key, 6)
    # ValueNet: Linear(dim_in,64)+ReLU -> Linear(64,128)+ReLU -> Linear(128,128)
    w1v, b1v = linear(keys[0], dim_in, 64)
    w2v, b2v = linear(keys[1], 64, 128)
    w3v, b3v = linear(keys[2], 128, 128)
    # AdvantageNet: Linear(2*dim_in,128)+ReLU -> Linear(128,128)+ReLU -> Linear(128,128)
    w1a, b1a = linear(keys[3], 2 * dim_in, 128)
    w2a, b2a = linear(keys[4], 128, 128)
    w3a, b3a = linear(keys[5], 128, 128)
    return (w1v, b1v, w2v, b2v, w3v, b3v, w1a, b1a, w2a, b2a, w3a, b3a)


def pack_params(params, dim_in):
    """Pack the 12 parameter tensors into one weight slab and one bias slab.

    The 64-wide value layer is zero-padded to 128 lanes (w1v cols, b1v cols) and
    the following layer's unused input rows are zero-padded (w2v rows 64:128),
    which is mathematically identical to the unpadded network.
    """
    (w1v, b1v, w2v, b2v, w3v, b3v, w1a, b1a, w2a, b2a, w3a, b3a) = params
    w1v_p = jnp.pad(w1v, ((0, 0), (0, 64)))          # (dim_in,128)
    b1v_p = jnp.pad(b1v, ((0, 0), (0, 64)))          # (1,128)
    w2v_p = jnp.pad(w2v, ((0, 64), (0, 0)))          # (128,128), rows 64: zero
    w_slab = jnp.concatenate(
        [w1v_p, w2v_p, w3v, w1a[:dim_in, :], w1a[dim_in:, :], w2a, w3a], axis=0)
    b_slab = jnp.concatenate(
        [b1v_p, b2v, b3v, b1a, b2a, b3a, jnp.zeros((2, 128), jnp.float32)], axis=0)  # (8,128)
    return w_slab, b_slab


def model_forward(observation, target_features, packed_params):
    """Pallas implementation of Model.forward.  Returns q of shape (B, N)."""
    B, dim_in = observation.shape
    _, N, tdim = target_features.shape
    assert tdim == dim_in
    w_slab, b_slab = packed_params
    tf_flat = target_features.reshape(B * N, dim_in)   # free reshape; no broadcast/concat
    vmem = pl.BlockSpec(memory_space=pltpu.MemorySpace.VMEM)
    return pl.pallas_call(
        make_dueling_kernel(B, N, dim_in),
        out_shape=jax.ShapeDtypeStruct((B, N), jnp.float32),
        in_specs=[vmem] * 4,
        out_specs=vmem,
    )(observation, tf_flat, w_slab, b_slab)


def model_forward_ref(observation, target_features, params):
    """Pure-JAX reference matching the PyTorch module semantics (raw params)."""
    (w1v, b1v, w2v, b2v, w3v, b3v, w1a, b1a, w2a, b2a, w3a, b3a) = params
    B, dim_in = observation.shape
    _, N, tdim = target_features.shape
    # ValueNet
    h = jnp.maximum(observation @ w1v + b1v, 0.0)
    h = jnp.maximum(h @ w2v + b2v, 0.0)
    v = h @ w3v + b3v                                     # (B, 128)
    # AdvantageNet
    uf = jnp.broadcast_to(observation[:, None, :], (B, N, dim_in))
    x = jnp.concatenate([uf, target_features], axis=2).reshape(-1, dim_in + tdim)
    h = jnp.maximum(x @ w1a + b1a, 0.0)
    h = jnp.maximum(h @ w2a + b2a, 0.0)
    a = (h @ w3a + b3a).reshape(B, N, 128)
    # inner(a, v)
    return jnp.sum(a * v[:, None, :], axis=2)             # (B, N)


if __name__ == "__main__":
    B, N, dim_in = 2, 8, 16   # dim_in multiple of 8 keeps all weight-slab slices tile-aligned

    key = jax.random.PRNGKey(0)
    k_obs, k_tgt, k_par = jax.random.split(key, 3)
    observation = jax.random.normal(k_obs, (B, dim_in), jnp.float32)
    target_features = jax.random.normal(k_tgt, (B, N, dim_in), jnp.float32)
    params = init_params(k_par, dim_in)
    packed = pack_params(params, dim_in)

    q = model_forward(observation, target_features, packed)
    q = jax.block_until_ready(q)

    q_ref = model_forward_ref(observation, target_features, params)
    assert q.shape == (B, N)
    assert jnp.allclose(q, q_ref, atol=1e-4, rtol=1e-4), "mismatch vs reference"

    print("KERNEL_OK")
</pallas_src>

<mosaic_0001>
module attributes {stable_mosaic.version = 11 : i64} {
  func.func @kernel(%arg0: memref<2x16xf32, #tpu.memory_space<vmem>>, %arg1: memref<16x16xf32, #tpu.memory_space<vmem>>, %arg2: memref<560x128xf32, #tpu.memory_space<vmem>>, %arg3: memref<8x128xf32, #tpu.memory_space<vmem>>, %arg4: memref<2x8xf32, #tpu.memory_space<vmem>>) attributes {dimension_semantics = [], scalar_prefetch = 0 : i64, scratch_operands = 0 : i64, tpu.core_type = #tpu.core_type<tc>} {
    %c0 = arith.constant 0 : index
    %c0_0 = arith.constant 0 : index
    %0 = vector.load %arg0[%c0, %c0_0] : memref<2x16xf32, #tpu.memory_space<vmem>>, vector<2x16xf32>
    %c0_1 = arith.constant 0 : index
    %c0_2 = arith.constant 0 : index
    %1 = vector.load %arg1[%c0_1, %c0_2] : memref<16x16xf32, #tpu.memory_space<vmem>>, vector<16x16xf32>
    %c0_3 = arith.constant 0 : index
    %c0_4 = arith.constant 0 : index
    %2 = vector.load %arg2[%c0_3, %c0_4] : memref<560x128xf32, #tpu.memory_space<vmem>>, vector<16x128xf32>
    %cst = arith.constant dense<0.000000e+00> : vector<2x128xf32>
    %3 = tpu.matmul %0, %2, %cst {dimension_numbers = #tpu.dot_dimension_numbers<[1], [0], [0], [1], [0, 0, 1, 1], [], []>} : vector<2x16xf32>, vector<16x128xf32>, vector<2x128xf32> -> vector<2x128xf32>
    %c0_5 = arith.constant 0 : index
    %c0_6 = arith.constant 0 : index
    %4 = vector.load %arg3[%c0_5, %c0_6] : memref<8x128xf32, #tpu.memory_space<vmem>>, vector<1x128xf32>
    %5 = vector.broadcast %4 : vector<1x128xf32> to vector<2x128xf32>
    %6 = arith.addf %3, %5 : vector<2x128xf32>
    %cst_7 = arith.constant 0.000000e+00 : f32
    %7 = vector.broadcast %cst_7 : f32 to vector<2x128xf32>
    %8 = arith.maximumf %6, %7 : vector<2x128xf32>
    %c16 = arith.constant 16 : index
    %c0_8 = arith.constant 0 : index
    %9 = vector.load %arg2[%c16, %c0_8] : memref<560x128xf32, #tpu.memory_space<vmem>>, vector<128x128xf32>
    %cst_9 = arith.constant dense<0.000000e+00> : vector<2x128xf32>
    %10 = tpu.matmul %8, %9, %cst_9 {dimension_numbers = #tpu.dot_dimension_numbers<[1], [0], [0], [1], [0, 0, 1, 1], [], []>} : vector<2x128xf32>, vector<128x128xf32>, vector<2x128xf32> -> vector<2x128xf32>
    %c1 = arith.constant 1 : index
    %c0_10 = arith.constant 0 : index
    %11 = vector.load %arg3[%c1, %c0_10] : memref<8x128xf32, #tpu.memory_space<vmem>>, vector<1x128xf32>
    %12 = vector.broadcast %11 : vector<1x128xf32> to vector<2x128xf32>
    %13 = arith.addf %10, %12 : vector<2x128xf32>
    %cst_11 = arith.constant 0.000000e+00 : f32
    %14 = vector.broadcast %cst_11 : f32 to vector<2x128xf32>
    %15 = arith.maximumf %13, %14 : vector<2x128xf32>
    %c144 = arith.constant 144 : index
    %c0_12 = arith.constant 0 : index
    %16 = vector.load %arg2[%c144, %c0_12] : memref<560x128xf32, #tpu.memory_space<vmem>>, vector<128x128xf32>
    %cst_13 = arith.constant dense<0.000000e+00> : vector<2x128xf32>
    %17 = tpu.matmul %15, %16, %cst_13 {dimension_numbers = #tpu.dot_dimension_numbers<[1], [0], [0], [1], [0, 0, 1, 1], [], []>} : vector<2x128xf32>, vector<128x128xf32>, vector<2x128xf32> -> vector<2x128xf32>
    %c2 = arith.constant 2 : index
    %c0_14 = arith.constant 0 : index
    %18 = vector.load %arg3[%c2, %c0_14] : memref<8x128xf32, #tpu.memory_space<vmem>>, vector<1x128xf32>
    %19 = vector.broadcast %18 : vector<1x128xf32> to vector<2x128xf32>
    %20 = arith.addf %17, %19 : vector<2x128xf32>
    %c272 = arith.constant 272 : index
    %c0_15 = arith.constant 0 : index
    %21 = vector.load %arg2[%c272, %c0_15] : memref<560x128xf32, #tpu.memory_space<vmem>>, vector<16x128xf32>
    %cst_16 = arith.constant dense<0.000000e+00> : vector<2x128xf32>
    %22 = tpu.matmul %0, %21, %cst_16 {dimension_numbers = #tpu.dot_dimension_numbers<[1], [0], [0], [1], [0, 0, 1, 1], [], []>} : vector<2x16xf32>, vector<16x128xf32>, vector<2x128xf32> -> vector<2x128xf32>
    %c288 = arith.constant 288 : index
    %c0_17 = arith.constant 0 : index
    %23 = vector.load %arg2[%c288, %c0_17] : memref<560x128xf32, #tpu.memory_space<vmem>>, vector<16x128xf32>
    %cst_18 = arith.constant dense<0.000000e+00> : vector<16x128xf32>
    %24 = tpu.matmul %1, %23, %cst_18 {dimension_numbers = #tpu.dot_dimension_numbers<[1], [0], [0], [1], [0, 0, 1, 1], [], []>} : vector<16x16xf32>, vector<16x128xf32>, vector<16x128xf32> -> vector<16x128xf32>
    %c3 = arith.constant 3 : index
    %c0_19 = arith.constant 0 : index
    %25 = vector.load %arg3[%c3, %c0_19] : memref<8x128xf32, #tpu.memory_space<vmem>>, vector<1x128xf32>
    %26 = vector.broadcast %25 : vector<1x128xf32> to vector<16x128xf32>
    %27 = arith.addf %24, %26 : vector<16x128xf32>
    %28 = vector.shape_cast %27 : vector<16x128xf32> to vector<2x8x128xf32>
    %29 = vector.shape_cast %22 : vector<2x128xf32> to vector<2x1x128xf32>
    %30 = vector.broadcast %29 : vector<2x1x128xf32> to vector<2x8x128xf32>
    %31 = arith.addf %28, %30 : vector<2x8x128xf32>
    %cst_20 = arith.constant 0.000000e+00 : f32
    %32 = vector.broadcast %cst_20 : f32 to vector<2x8x128xf32>
    %33 = arith.maximumf %31, %32 : vector<2x8x128xf32>
    %34 = vector.shape_cast %33 : vector<2x8x128xf32> to vector<16x128xf32>
    %c304 = arith.constant 304 : index
    %c0_21 = arith.constant 0 : index
    %35 = vector.load %arg2[%c304, %c0_21] : memref<560x128xf32, #tpu.memory_space<vmem>>, vector<128x128xf32>
    %cst_22 = arith.constant dense<0.000000e+00> : vector<16x128xf32>
    %36 = tpu.matmul %34, %35, %cst_22 {dimension_numbers = #tpu.dot_dimension_numbers<[1], [0], [0], [1], [0, 0, 1, 1], [], []>} : vector<16x128xf32>, vector<128x128xf32>, vector<16x128xf32> -> vector<16x128xf32>
    %c4 = arith.constant 4 : index
    %c0_23 = arith.constant 0 : index
    %37 = vector.load %arg3[%c4, %c0_23] : memref<8x128xf32, #tpu.memory_space<vmem>>, vector<1x128xf32>
    %38 = vector.broadcast %37 : vector<1x128xf32> to vector<16x128xf32>
    %39 = arith.addf %36, %38 : vector<16x128xf32>
    %cst_24 = arith.constant 0.000000e+00 : f32
    %40 = vector.broadcast %cst_24 : f32 to vector<16x128xf32>
    %41 = arith.maximumf %39, %40 : vector<16x128xf32>
    %c432 = arith.constant 432 : index
    %c0_25 = arith.constant 0 : index
    %42 = vector.load %arg2[%c432, %c0_25] : memref<560x128xf32, #tpu.memory_space<vmem>>, vector<128x128xf32>
    %cst_26 = arith.constant dense<0.000000e+00> : vector<16x128xf32>
    %43 = tpu.matmul %41, %42, %cst_26 {dimension_numbers = #tpu.dot_dimension_numbers<[1], [0], [0], [1], [0, 0, 1, 1], [], []>} : vector<16x128xf32>, vector<128x128xf32>, vector<16x128xf32> -> vector<16x128xf32>
    %c5 = arith.constant 5 : index
    %c0_27 = arith.constant 0 : index
    %44 = vector.load %arg3[%c5, %c0_27] : memref<8x128xf32, #tpu.memory_space<vmem>>, vector<1x128xf32>
    %45 = vector.broadcast %44 : vector<1x128xf32> to vector<16x128xf32>
    %46 = arith.addf %43, %45 : vector<16x128xf32>
    %47 = vector.shape_cast %46 : vector<16x128xf32> to vector<2x8x128xf32>
    %48 = vector.shape_cast %20 : vector<2x128xf32> to vector<2x1x128xf32>
    %49 = vector.broadcast %48 : vector<2x1x128xf32> to vector<2x8x128xf32>
    %50 = arith.mulf %47, %49 : vector<2x8x128xf32>
    %cst_28 = arith.constant dense<0.000000e+00> : vector<2x8xf32>
    %51 = vector.multi_reduction <add>, %50, %cst_28 [2] : vector<2x8x128xf32> to vector<2x8xf32>
    %c0_29 = arith.constant 0 : index
    %c0_30 = arith.constant 0 : index
    %52 = vector.load %arg4[%c0_29, %c0_30] : memref<2x8xf32, #tpu.memory_space<vmem>>, vector<2x8xf32>
    tpu.vector_store %arg4[%c0_29, %c0_30], %51 {strides = array<i32>} : memref<2x8xf32, #tpu.memory_space<vmem>>, vector<2x8xf32>,
    return
  }
}

</mosaic_0001>

<bundles_post_ra>
// kernel: tpu_custom_call.1
= control target key start
LH: loop header
LB: loop body
LE: loop exit
PB: predicated region body
PF: predicated region fallthrough
CT: control target
= control target key end

     0   :  { %9 = vsyncpa [#allocation3], 0  ;;  %s1406_s0 = inlined_call_operand.hbm [shape: f32[2,16], index: 0, kind: input, shape index: {}]   ;;  %s1407_s1 = inlined_call_operand.hbm [shape: f32[16,16], index: 1, kind: input, shape index: {}]   ;;  %s1408_s2 = inlined_call_operand.hbm [shape: f32[560,128], index: 2, kind: input, shape index: {}]   ;;  %s1409_s3 = inlined_call_operand.vmem [shape: f32[8,128], index: 3, kind: input, shape index: {}]   ;;  %s1410_s4 = inlined_call_operand.hbm [shape: f32[2,8], index: 4, kind: output, shape index: {}]  }
   0x1   :  { %10 = vsyncpa [#allocation6], 0 }
   0x2   :  { %11 = vsyncpa [#allocation4], 0  ;;  %s1265_s15 = smov [#allocation5]   ;;  %s1171_s19 = scalar_lea.hbm %s1407_s1, 256 }
   0x3   :  { %s27_s16 = sshll.u32 %s1265_s15, 4  ;;  %p1172_p0 = scmp.ne.s32.totalorder %s1407_s1, %s1171_s19  ;;  %s28_s16 = int_to_ptr.vmem [resolvable:$true] %s27_s16 }
   0x4   :  { %p1175_p1 = scmp.lt.u32.totalorder %s1171_s19, %s1407_s1 }
   0x6   :  { %p1177_p2 = pnand %p1175_p1, %p1172_p0 }
   0x8   :  { %1180 = shalt.err (!%p1177_p2)
}
   0x9   :  { %s1181_s24 = scalar_lea.vmem %s28_s16, 256  ;;  %p1186_p4 = scmp.lt.s32.totalorder %s28_s16, %s28_s16 }
   0xa   :  { %p1182_p3 = scmp.ne.s32.totalorder %s28_s16, %s1181_s24  ;;  %p1187_p5 = scmp.lt.s32.totalorder %s1181_s24, %s1181_s24 }
   0xc   :  { %p1188_p6 = por %p1187_p5, %p1186_p4 }
   0xe   :  { %p1189_p7 = pnand %p1188_p6, %p1182_p3 }
  0x10   :  { %1192 = shalt.err (!%p1189_p7)
}
  0x11   :  { %s1266_s25 = smov 128   ;;  %s1267_s26 = smov 8  }
  0x12   :  { %33 = dma.hbm_to_vmem [thread:$0]  %s1407_s1, 256, %s28_s16, [#allocation6], %s1266_s25, %s1266_s25, %s1267_s26  }
  0x13   :  { %s1268_s29 = smov [#allocation2]   ;;  %s1269_s5 = smov [#allocation7]  }
  0x14   :  { %s18_s30 = sshll.u32 %s1268_s29, 4  ;;  %s39_s6 = sshll.u32 %s1269_s5, 4  ;;  %s19_s30 = int_to_ptr.vmem [resolvable:$true] %s18_s30  ;;  %s40_s6 = int_to_ptr.vmem [resolvable:$true] %s39_s6 }
  0x15   :  { %s1193_s9 = scalar_lea.hbm %s1406_s0, 32 }
  0x16   :  { %p1194_p8 = scmp.ne.s32.totalorder %s1406_s0, %s1193_s9  ;;  %p1197_p9 = scmp.lt.u32.totalorder %s1193_s9, %s1406_s0 }
  0x18   :  { %p1199_p10 = pnand %p1197_p9, %p1194_p8 }
  0x1a   :  { %1202 = shalt.err (!%p1199_p10)
}
  0x1b   :  { %s1203_s1 = scalar_lea.vmem %s19_s30, 32  ;;  %p1208_p12 = scmp.lt.s32.totalorder %s19_s30, %s19_s30 }
  0x1c   :  { %p1204_p11 = scmp.ne.s32.totalorder %s19_s30, %s1203_s1  ;;  %p1209_p13 = scmp.lt.s32.totalorder %s1203_s1, %s1203_s1 }
  0x1e   :  { %p1210_p0 = por %p1209_p13, %p1208_p12 }
  0x20   :  { %p1211_p1 = pnand %p1210_p0, %p1204_p11 }
  0x22   :  { %1214 = shalt.err (!%p1211_p1)
}
  0x23   :  { %21 = dma.hbm_to_vmem [thread:$0]  %s1406_s0, 32, %s19_s30, [#allocation3]  }
  0x24   :  { %s1215_s18 = scalar_lea.hbm %s1408_s2, 8960 }
  0x25   :  { %p1216_p2 = scmp.ne.s32.totalorder %s1408_s2, %s1215_s18  ;;  %p1219_p3 = scmp.lt.u32.totalorder %s1215_s18, %s1408_s2 }
  0x27   :  { %p1221_p4 = pnand %p1219_p3, %p1216_p2 }
  0x29   :  { %1224 = shalt.err (!%p1221_p4)
}
  0x2a   :  { %s1225_s23 = scalar_lea.vmem %s40_s6, 8960  ;;  %p1230_p6 = scmp.lt.s32.totalorder %s40_s6, %s40_s6 }
  0x2b   :  { %p1226_p5 = scmp.ne.s32.totalorder %s40_s6, %s1225_s23  ;;  %p1231_p7 = scmp.lt.s32.totalorder %s1225_s23, %s1225_s23 }
  0x2d   :  { %p1232_p8 = por %p1231_p7, %p1230_p6 }
  0x2f   :  { %p1233_p9 = pnand %p1232_p8, %p1226_p5 }
  0x31   :  { %1236 = shalt.err (!%p1233_p9)
}
  0x32   :  { %45 = dma.hbm_to_vmem [thread:$0]  %s1408_s2, 8960, %s40_s6, [#allocation6], %s1266_s25, %s1266_s25, %s1267_s26  }
  0x33   :  { %1259 = dma.done.wait [#allocation3], 32  }
  0x34   :  { %1260 = vsyncadd [#allocation3], 4294967264 }
  0x35   :  { %1261 = dma.done.wait [#allocation6], 9216  }
  0x36   :  { %1262 = vsyncadd [#allocation6], 4294958080  ;;  %v1270_v0 = vmov 0.0|0.0   ;;  %vm1271_vm0 = vmmov 0   ;;  %v1272_v1 = vmov 0.0   ;;  %v60_v2 = vld [vmem:[#allocation7] sm:$0xff] }
  0x37   :  { %1039 = vmatprep.subr.bf16.mxu0 %v1270_v0  ;;  %882 = vmatprep.mubr.msk.f32.mxu0 %vm1271_vm0, %v1272_v1  ;;  %v61_v3 = vld [vmem:[#allocation7 + $0x8] sm:$0xff]  ;;  %v142_v5 = vld [vmem:[#allocation7 + $0x10] sm:$0xff]  ;;  %v143_v6 = vld [vmem:[#allocation7 + $0x18] sm:$0xff]  ;;  %vm67_vm1 = vcmask 130048   ;;  %s1274_s10 = smov [#allocation8]   ;;  %vm767_vm2 = vcmask 1041409  }
  0x38   :  { %1042 = vmatprep.subr.bf16.mxu1 %v1270_v0  ;;  %917 = vmatprep.mubr.msk.f32.mxu1 %vm1271_vm0, %v1272_v1  ;;  %v1040_v4 = vpack.c.bf16 %v61_v3, %v60_v2  ;;  %v144_v7 = vld [vmem:[#allocation7 + $0x20] sm:$0xff]  ;;  %v1043_v8 = vpack.c.bf16 %v143_v6, %v142_v5  ;;  %v145_v9 = vld [vmem:[#allocation7 + $0x28] sm:$0xff]  ;;  %v146_v12 = vld [vmem:[#allocation7 + $0x30] sm:$0xff]  ;;  %s778_s11 = sshll.u32 %s1274_s10, 4  ;;  %vm770_vm3 = vcmask 58368   ;;  %s779_s11 = int_to_ptr.vmem [resolvable:$true] %s778_s11 }
  0x39   :  { %v1348_v10 = vld [vmem:[#allocation2] sm:$0x3]  ;;  %v1046_v11 = vpack.c.bf16 %v145_v9, %v144_v7  ;;  %v147_v13 = vld [vmem:[#allocation7 + $0x38] sm:$0xff]  ;;  %v148_v15 = vld [vmem:[#allocation7 + $0x40] sm:$0xff]  ;;  %p1242_p11 = scmp.lt.s32.totalorder %s779_s11, %s779_s11 }
  0x3a   :  { %1041 = vmatpush3.bf16.msra.mxu0 %v1040_v4  ;;  %1044 = vmatpush3.bf16.msra.mxu1 %v1043_v8  ;;  %v1049_v14 = vpack.c.bf16 %v147_v13, %v146_v12  ;;  %v149_v16 = vld [vmem:[#allocation7 + $0x48] sm:$0xff]  ;;  %v150_v18 = vld [vmem:[#allocation7 + $0x50] sm:$0xff]  ;;  %v151_v19 = vld [vmem:[#allocation7 + $0x58] sm:$0xff] }
  0x3b   :  { %1066 = vmatprep.subr.bf16.mxu0 %v1270_v0  ;;  %1045 = vmatprep.subr.bf16.mxu1 %v1270_v0  ;;  %v1052_v17 = vpack.c.bf16 %v149_v16, %v148_v15  ;;  %v1055_v20 = vpack.c.bf16 %v151_v19, %v150_v18  ;;  %v152_v21 = vld [vmem:[#allocation7 + $0x60] sm:$0xff]  ;;  %v153_v22 = vld [vmem:[#allocation7 + $0x68] sm:$0xff]  ;;  %v154_v24 = vld [vmem:[#allocation7 + $0x70] sm:$0xff] }
  0x3c   :  { %v1058_v23 = vpack.c.bf16 %v153_v22, %v152_v21  ;;  %v155_v25 = vld [vmem:[#allocation7 + $0x78] sm:$0xff]  ;;  %v156_v27 = vld [vmem:[#allocation7 + $0x80] sm:$0xff]  ;;  %v157_v28 = vld [vmem:[#allocation7 + $0x88] sm:$0xff] }
  0x3d   :  { %883 = vmatmul.mubr.msk.f32.vlgmr.msra.gmra.mrb[0].mxu0 %vm67_vm1, %v1348_v10  ;;  %v1061_v26 = vpack.c.bf16 %v155_v25, %v154_v24  ;;  %v1064_v29 = vpack.c.bf16 %v157_v28, %v156_v27  ;;  %v234_v30 = vld [vmem:[#allocation7 + $0x90] sm:$0xff]  ;;  %v235_v31 = vld [vmem:[#allocation7 + $0x98] sm:$0xff]  ;;  %v236_v32 = vld [vmem:[#allocation7 + $0xa0] sm:$0xff] }
  0x3e   :  { %952 = vmatprep.mubr.msk.f32.mxu0 %vm1271_vm0, %v1272_v1  ;;  %1047 = vmatpush3.bf16.msra.mxu1 %v1046_v11  ;;  %v1067_v33 = vpack.c.bf16 %v235_v31, %v234_v30  ;;  %v237_v34 = vld [vmem:[#allocation7 + $0xa8] sm:$0xff]  ;;  %v238_v36 = vld [vmem:[#allocation7 + $0xb0] sm:$0xff]  ;;  %v239_v37 = vld [vmem:[#allocation7 + $0xb8] sm:$0xff] }
  0x3f   :  { %1048 = vmatprep.subr.bf16.mxu1 %v1270_v0  ;;  %v1070_v35 = vpack.c.bf16 %v237_v34, %v236_v32  ;;  %v1073_v38 = vpack.c.bf16 %v239_v37, %v238_v36  ;;  %v240_v39 = vld [vmem:[#allocation7 + $0xc0] sm:$0xff]  ;;  %v241_v40 = vld [vmem:[#allocation7 + $0xc8] sm:$0xff]  ;;  %v242_v42 = vld [vmem:[#allocation7 + $0xd0] sm:$0xff] }
  0x40   :  { %1068 = vmatpush3.bf16.msra.mxu0 %v1067_v33  ;;  %v1076_v41 = vpack.c.bf16 %v241_v40, %v240_v39  ;;  %v243_v43 = vld [vmem:[#allocation7 + $0xd8] sm:$0xff]  ;;  %v244_v45 = vld [vmem:[#allocation7 + $0xe0] sm:$0xff]  ;;  %v245_v46 = vld [vmem:[#allocation7 + $0xe8] sm:$0xff] }
  0x41   :  { %1069 = vmatprep.subr.bf16.mxu0 %v1270_v0  ;;  %v1079_v44 = vpack.c.bf16 %v243_v43, %v242_v42  ;;  %v1082_v47 = vpack.c.bf16 %v245_v46, %v244_v45  ;;  %v246_v48 = vld [vmem:[#allocation7 + $0xf0] sm:$0xff]  ;;  %v247_v49 = vld [vmem:[#allocation7 + $0xf8] sm:$0xff]  ;;  %v788_v51 = vld [vmem:[%s1409_s3] ss:$0 sm:$0xff] }
  0x42   :  { %1050 = vmatpush3.bf16.msra.mxu1 %v1049_v14  ;;  %v1085_v50 = vpack.c.bf16 %v247_v49, %v246_v48  ;;  %v325_v56 = vld [vmem:[#allocation7 + $0x110] sm:$0xff]  ;;  %v326_v57 = vld [vmem:[#allocation7 + $0x118] sm:$0xff]  ;;  %v248_v59 = vld [vmem:[#allocation7 + $0x100] sm:$0xff] }
  0x43   :  { %1051 = vmatprep.subr.bf16.mxu1 %v1270_v0  ;;  %v1091_v58 = vpack.c.bf16 %v326_v57, %v325_v56  ;;  %v249_v60 = vld [vmem:[#allocation7 + $0x108] sm:$0xff]  ;;  %v397_v62 = vld [vmem:[#allocation7 + $0x120] sm:$0xff]  ;;  %v522_v2 = vld [vmem:[#allocation7 + $0x130] sm:$0xff]  ;;  %v489_v57 = vlaneseq }
  0x44   :  { %1071 = vmatpush3.bf16.msra.mxu0 %v1070_v35  ;;  %v1088_v61 = vpack.c.bf16 %v249_v60, %v248_v59  ;;  %v398_v63 = vld [vmem:[#allocation7 + $0x128] sm:$0xff]  ;;  %v523_v3 = vld [vmem:[#allocation7 + $0x138] sm:$0xff]  ;;  %v524_v4 = vld [vmem:[#allocation7 + $0x140] sm:$0xff] }
  0x45   :  { %1072 = vmatprep.subr.bf16.mxu0 %v1270_v0  ;;  %v1097_v5 = vpack.c.bf16 %v523_v3, %v522_v2  ;;  %v526_v7 = vld [vmem:[#allocation7 + $0x150] sm:$0xff]  ;;  %v527_v8 = vld [vmem:[#allocation7 + $0x158] sm:$0xff]  ;;  %v528_v11 = vld [vmem:[#allocation7 + $0x160] sm:$0xff]  ;;  %v490_v59 = vshrl.u32 %v489_v57, 7 }
  0x46   :  { %1053 = vmatpush3.bf16.msra.mxu1 %v1052_v17  ;;  %v1105_v9 = vpack.c.bf16 %v527_v8, %v526_v7  ;;  %v529_v12 = vld [vmem:[#allocation7 + $0x168] sm:$0xff]  ;;  %v531_v14 = vld [vmem:[#allocation7 + $0x178] sm:$0xff]  ;;  %v790_v16 = vld [vmem:[%s1409_s3 + $0x1] ss:$0 sm:$0xff] }
  0x47   :  { %1054 = vmatprep.subr.bf16.mxu1 %v1270_v0  ;;  %v1109_v13 = vpack.c.bf16 %v529_v12, %v528_v11  ;;  %v58_v21 = vld [vmem:[#allocation5] sm:$0xff]  ;;  %v59_v22 = vld [vmem:[#allocation5 + $0x8] sm:$0xff]  ;;  %v532_v24 = vld [vmem:[#allocation7 + $0x180] sm:$0xff] }
  0x48   :  { %1074 = vmatpush3.bf16.msra.mxu0 %v1073_v38  ;;  %v533_v25 = vld [vmem:[#allocation7 + $0x188] sm:$0xff]  ;;  %v534_v28 = vld [vmem:[#allocation7 + $0x190] sm:$0xff]  ;;  %v536_v31 = vld [vmem:[#allocation7 + $0x1a0] sm:$0xff] }
  0x49   :  { %1075 = vmatprep.subr.bf16.mxu0 %v1270_v0  ;;  %v1117_v27 = vpack.c.bf16 %v533_v25, %v532_v24  ;;  %v537_v32 = vld [vmem:[#allocation7 + $0x1a8] sm:$0xff]  ;;  %v620_v34 = vld [vmem:[#allocation7 + $0x1b0] sm:$0xff]  ;;  %v621_v35 = vld [vmem:[#allocation7 + $0x1b8] sm:$0xff] }
  0x4a   :  { %1056 = vmatpush3.bf16.msra.mxu1 %v1055_v20  ;;  %v1125_v33 = vpack.c.bf16 %v537_v32, %v536_v31  ;;  %v622_v36 = vld [vmem:[#allocation7 + $0x1c0] sm:$0xff]  ;;  %v1129_v37 = vpack.c.bf16 %v621_v35, %v620_v34  ;;  %v623_v38 = vld [vmem:[#allocation7 + $0x1c8] sm:$0xff]  ;;  %v624_v40 = vld [vmem:[#allocation7 + $0x1d0] sm:$0xff] }
  0x4b   :  { %1057 = vmatprep.subr.bf16.mxu1 %v1270_v0  ;;  %v1133_v39 = vpack.c.bf16 %v623_v38, %v622_v36  ;;  %v626_v43 = vld [vmem:[#allocation7 + $0x1e0] sm:$0xff]  ;;  %v628_v46 = vld [vmem:[#allocation7 + $0x1f0] sm:$0xff]  ;;  %v791_v25 = vld [vmem:[%s1409_s3 + $0x2] ss:$0 sm:$0xff] }
  0x4c   :  { %1077 = vmatpush3.bf16.msra.mxu0 %v1076_v41  ;;  %v625_v41 = vld [vmem:[#allocation7 + $0x1d8] sm:$0xff]  ;;  %v630_v49 = vld [vmem:[#allocation7 + $0x200] sm:$0xff] }
  0x4d   :  { %1078 = vmatprep.subr.bf16.mxu0 %v1270_v0  ;;  %v1137_v42 = vpack.c.bf16 %v625_v41, %v624_v40  ;;  %v758_v40 = vand.u32 127, %v489_v57 }
  0x4e   :  { %1059 = vmatpush3.bf16.msra.mxu1 %v1058_v23 }
  0x4f   :  { %1060 = vmatprep.subr.bf16.mxu1 %v1270_v0 }
  0x50   :  { %1080 = vmatpush3.bf16.msra.mxu0 %v1079_v44  ;;  %v627_v44 = vld [vmem:[#allocation7 + $0x1e8] sm:$0xff] }
  0x51   :  { %1081 = vmatprep.subr.bf16.mxu0 %v1270_v0  ;;  %v1141_v45 = vpack.c.bf16 %v627_v44, %v626_v43 }
  0x52   :  { %1062 = vmatpush3.bf16.msra.mxu1 %v1061_v26 }
  0x53   :  { %1063 = vmatprep.subr.bf16.mxu1 %v1270_v0 }
  0x54   :  { %1083 = vmatpush3.bf16.msra.mxu0 %v1082_v47  ;;  %v629_v47 = vld [vmem:[#allocation7 + $0x1f8] sm:$0xff] }
  0x55   :  { %1084 = vmatprep.subr.bf16.mxu0 %v1270_v0  ;;  %v1145_v48 = vpack.c.bf16 %v629_v47, %v628_v46 }
  0x56   :  { %1065 = vmatpush3.bf16.msra.mxu1 %v1064_v29  ;;  %v535_v29 = vld [vmem:[#allocation7 + $0x198] sm:$0xff] }
  0x57   :  { %1090 = vmatprep.subr.bf16.mxu1 %v1270_v0  ;;  %v1121_v30 = vpack.c.bf16 %v535_v29, %v534_v28 }
  0x58   :  { %1086 = vmatpush3.bf16.msra.mxu0 %v1085_v50  ;;  %v631_v50 = vld [vmem:[#allocation7 + $0x208] sm:$0xff] }
  0x59   :  { %1087 = vmatprep.subr.bf16.mxu0 %v1270_v0  ;;  %v1093_v0 = vpack.c.bf16 %v398_v63, %v397_v62 }
  0x5c   :  { %1089 = vmatpush3.bf16.msra.mxu0 %v1088_v61 }
  0x5d   :  { %1094 = vmatprep.subr.bf16.mxu0 %v1093_v0 }
 0x110   :  { %v137_v52 = vpop.f32.mrb[0].mxu0 }
 0x111   :  { %v138_v53 = vadd.f32 %v788_v51, %v137_v52  ;;  %v884_v54 = vpop.f32.mrb[1].mxu0  ;;  %v1149_v51 = vpack.c.bf16 %v631_v50, %v630_v49  ;;  %v632_v52 = vld [vmem:[#allocation7 + $0x210] sm:$0xff] }
 0x113   :  { %v141_v55 = vmax.f32 %v138_v53, 0.0  ;;  %v633_v53 = vld [vmem:[#allocation7 + $0x218] sm:$0xff] }
 0x114   :  { %v1153_v54 = vpack.c.bf16 %v633_v53, %v632_v52 }
 0x115   :  { %918 = vmatmul.mubr.f32.vlgmr.msra.gmra.mrb[0].mxu1 %v141_v55  ;;  %v1273_v55 = vmov 1966171168  }
 0x116   :  { %959 = vmatprep.mubr.msk.f32.mxu1 %vm1271_vm0, %v1272_v1  ;;  %1092 = vmatpush3.bf16.msra.mxu1 %v1091_v58  ;;  %v525_v1 = vld [vmem:[#allocation7 + $0x148] sm:$0xff]  ;;  %v487_v56 = vunpack.c.l.s4 %v1273_v55 }
 0x117   :  { %v1101_v6 = vpack.c.bf16 %v525_v1, %v524_v4  ;;  %1098 = vmatprep.subr.bf16.mxu1 %v1097_v5 }
 0x118   :  { %v488_v58 = vunpack.c.0.s8 %v487_v56 }
 0x119   :  { %960 = vmatmul.mubr.msk.f32.vlgmr.msra.gmra.mrb[2].mxu1 %vm67_vm1, %v1348_v10  ;;  %v530_v10 = vld [vmem:[#allocation7 + $0x170] sm:$0xff] }
 0x11a   :  { %1100 = vmatpush3.bf16.msra.mxu1 %v1097_v5  ;;  %v1113_v15 = vpack.c.bf16 %v531_v14, %v530_v10  ;;  %v491_v60 = vsub.s32 %v488_v58, %v490_v59  ;;  %v793_v5 = vld [vmem:[%s1409_s3 + $0x3] ss:$0 sm:$0xff] }
 0x11b   :  { %1102 = vmatprep.subr.bf16.mxu1 %v1101_v6 }
 0x11e   :  { %1104 = vmatpush3.bf16.msra.mxu1 %v1101_v6 }
 0x11f   :  { %1106 = vmatprep.subr.bf16.mxu1 %v1105_v9 }
 0x122   :  { %1108 = vmatpush3.bf16.msra.mxu1 %v1105_v9 }
 0x123   :  { %1110 = vmatprep.subr.bf16.mxu1 %v1109_v13 }
 0x126   :  { %1112 = vmatpush3.bf16.msra.mxu1 %v1109_v13 }
 0x127   :  { %1114 = vmatprep.subr.bf16.mxu1 %v1113_v15 }
 0x12a   :  { %1116 = vmatpush3.bf16.msra.mxu1 %v1113_v15  ;;  %v634_v15 = vld [vmem:[#allocation7 + $0x220] sm:$0xff] }
 0x12b   :  { %1118 = vmatprep.subr.bf16.mxu1 %v1117_v27 }
 0x12e   :  { %1120 = vmatpush3.bf16.msra.mxu1 %v1117_v27 }
 0x12f   :  { %1122 = vmatprep.subr.bf16.mxu1 %v1121_v30 }
 0x132   :  { %1124 = vmatpush3.bf16.msra.mxu1 %v1121_v30  ;;  %v797_v30 = vld [vmem:[%s1409_s3 + $0x5] ss:$0 sm:$0xff] }
 0x133   :  { %1126 = vmatprep.subr.bf16.mxu1 %v1125_v33 }
 0x136   :  { %1128 = vmatpush3.bf16.msra.mxu1 %v1125_v33 }
 0x1e8   :  { %v229_v17 = vpop.f32.mrb[0].mxu1 }
 0x1e9   :  { %v230_v18 = vadd.f32 %v790_v16, %v229_v17  ;;  %v919_v19 = vpop.f32.mrb[1].mxu1  ;;  %v635_v16 = vld [vmem:[#allocation7 + $0x228] sm:$0xff] }
 0x1ea   :  { %v1157_v17 = vpack.c.bf16 %v635_v16, %v634_v15 }
 0x1eb   :  { %v233_v20 = vmax.f32 %v230_v18, 0.0  ;;  %v796_v18 = vld [vmem:[%s1409_s3 + $0x4] ss:$0 sm:$0xff]  ;;  %s1237_s3 = scalar_lea.vmem %s779_s11, 32 }
 0x1ec   :  { %v393_v23 = vpop.f32.mrb[2].mxu1  ;;  %p1238_p10 = scmp.ne.s32.totalorder %s779_s11, %s1237_s3  ;;  %p1243_p12 = scmp.lt.s32.totalorder %s1237_s3, %s1237_s3 }
 0x1ed   :  { %953 = vmatmul.mubr.f32.vlgmr.msra.gmra.mrb[2].mxu0 %v233_v20  ;;  %v961_v26 = vpop.f32.mrb[3].mxu1  ;;  %v492_v61 = vrot.slane %v393_v23, %v491_v60 }
 0x1ee   :  { %1096 = vmatpush3.bf16.msra.mxu0 %v1093_v0  ;;  %966 = vmatprep.mubr.msk.f32.mxu0 %vm67_vm1, %v58_v21  ;;  %v510_v0 = vsub.s32 0, %v490_v59  ;;  %p1244_p13 = por %p1243_p12, %p1242_p11 }
 0x1ef   :  { %1130 = vmatprep.subr.bf16.mxu0 %v1129_v37  ;;  %v493_v62 = vcombine.high %v492_v61, %v492_v61  ;;  %v500_v2 = vrot.slane %v492_v61, %v491_v60 }
 0x1f0   :  { %p1245_p0 = pnand %p1244_p13, %p1238_p10 }
 0x1f1   :  { %967 = vmatmul.mubr.msk.f32.vlgmr.msra.gmra.mrb[4].mxu0 %vm67_vm1, %v59_v22  ;;  %v507_v63 = vrot.slane %v493_v62, %v491_v60  ;;  %v511_v7 = vrot.slane %v500_v2, %v510_v0 }
 0x1f2   :  { %1132 = vmatpush3.bf16.msra.mxu0 %v1129_v37 }
 0x1f3   :  { %1134 = vmatprep.subr.bf16.mxu0 %v1133_v39  ;;  %v515_v1 = vrot.slane %v507_v63, %v510_v0 }
 0x1f6   :  { %1136 = vmatpush3.bf16.msra.mxu0 %v1133_v39 }
 0x1f7   :  { %1138 = vmatprep.subr.bf16.mxu0 %v1137_v42 }
 0x1fa   :  { %1140 = vmatpush3.bf16.msra.mxu0 %v1137_v42  ;;  %v761_v42 = vsub.s32 %v758_v40, %v490_v59 }
 0x1fb   :  { %1142 = vmatprep.subr.bf16.mxu0 %v1141_v45 }
 0x1fe   :  { %1144 = vmatpush3.bf16.msra.mxu0 %v1141_v45 }
 0x1ff   :  { %1146 = vmatprep.subr.bf16.mxu0 %v1145_v48 }
 0x202   :  { %1148 = vmatpush3.bf16.msra.mxu0 %v1145_v48 }
 0x203   :  { %1150 = vmatprep.subr.bf16.mxu0 %v1149_v51 }
 0x206   :  { %1152 = vmatpush3.bf16.msra.mxu0 %v1149_v51 }
 0x207   :  { %1154 = vmatprep.subr.bf16.mxu0 %v1153_v54 }
 0x20a   :  { %1156 = vmatpush3.bf16.msra.mxu0 %v1153_v54 }
 0x20b   :  { %1158 = vmatprep.subr.bf16.mxu0 %v1157_v17 }
 0x20e   :  { %1160 = vmatpush3.bf16.msra.mxu0 %v1157_v17 }
 0x2c0   :  { %v321_v3 = vpop.f32.mrb[2].mxu0 }
 0x2c1   :  { %v954_v4 = vpop.f32.mrb[3].mxu0  ;;  %v322_v26 = vadd.f32 %v791_v25, %v321_v3 }
 0x2c3   :  { %v723_v27 = vrot.slane %v322_v26, %v491_v60 }
 0x2c4   :  { %v968_v6 = vpop.f32.mrb[4].mxu0 }
 0x2c5   :  { %v482_v8 = vadd.f32 %v968_v6, %v793_v5  ;;  %v476_v9 = vpop.f32.mrb[5].mxu0  ;;  %v724_v28 = vcombine.high %v723_v27, %v723_v27  ;;  %v731_v31 = vrot.slane %v723_v27, %v491_v60 }
 0x2c6   :  { %v477_v11 = vadd.f32 %v793_v5, %v476_v9 }
 0x2c7   :  { %v519_v12 = vadd.f32 %v515_v1, %v482_v8  ;;  %v738_v29 = vrot.slane %v724_v28, %v491_v60  ;;  %v742_v37 = vrot.slane %v731_v31, %v510_v0 }
 0x2c8   :  { %v518_v13 = vadd.f32 %v511_v7, %v477_v11 }
 0x2c9   :  { %v521_v14 = vmax.f32 %v519_v12, 0.0  ;;  %v746_v35 = vrot.slane %v738_v29, %v510_v0 }
 0x2ca   :  { %v520_v10 = vmax.f32 %v518_v13, 0.0 }
 0x2cc   :  { %1001 = vmatprep.mubr.f32.mxu1 %v520_v10 }
 0x2cd   :  { %1002 = vmatmul.mubr.f32.vlgmr.msra.gmra.mrb[4].mxu1 %v521_v14 }
 0x3a0   :  { %v1003_v19 = vpop.f32.mrb[4].mxu1 }
 0x3a1   :  { %v615_v20 = vadd.f32 %v1003_v19, %v796_v18  ;;  %v609_v21 = vpop.f32.mrb[5].mxu1 }
 0x3a2   :  { %v610_v22 = vadd.f32 %v796_v18, %v609_v21 }
 0x3a3   :  { %v619_v24 = vmax.f32 %v615_v20, 0.0 }
 0x3a4   :  { %v618_v23 = vmax.f32 %v610_v22, 0.0 }
 0x3a6   :  { %1036 = vmatprep.mubr.f32.mxu0 %v618_v23 }
 0x3a7   :  { %1037 = vmatmul.mubr.f32.vlgmr.msra.gmra.mrb[6].mxu0 %v619_v24 }
 0x47a   :  { %v1038_v32 = vpop.f32.mrb[6].mxu0 }
 0x47b   :  { %v713_v33 = vadd.f32 %v1038_v32, %v797_v30  ;;  %v707_v34 = vpop.f32.mrb[7].mxu0 }
 0x47c   :  { %v708_v36 = vadd.f32 %v797_v30, %v707_v34 }
 0x47d   :  { %v750_v38 = vmul.f32 %v746_v35, %v713_v33 }
 0x47e   :  { %v749_v39 = vmul.f32 %v742_v37, %v708_v36 }
 0x480   :  { %751 = vadd.xlane.f32.xlu0 %v749_v39 }
 0x484   :  { %753 = vadd.xlane.f32.xlu0 %v750_v38 }
 0x50d   :  { %v752_v41 = vpop.xlane.xlu0 %751 }
 0x50e   :  { %v762_v44 = vrot.slane %v752_v41, %v761_v42 }
 0x511   :  { %v754_v43 = vpop.xlane.xlu0 %753 }
 0x512   :  { %v766_v45 = vrot.slane %v754_v43, %v761_v42 }
 0x514   :  { %v768_v46 = vsel %vm767_vm2, %v766_v45, %v762_v44 }
 0x515   :  { %771 = vst.msk [vmem:[#allocation8] sm:$0x3] %vm770_vm3, %v768_v46 }
 0x516   :  { %1248 = shalt.err (!%p1245_p0)
}
 0x517   :  { %s1249_s1 = scalar_lea.hbm %s1410_s4, 32 }
 0x518   :  { %p1250_p1 = scmp.ne.s32.totalorder %s1410_s4, %s1249_s1  ;;  %p1253_p2 = scmp.lt.u32.totalorder %s1249_s1, %s1410_s4 }
 0x51a   :  { %p1255_p3 = pnand %p1253_p2, %p1250_p1 }
 0x51c   :  { %1258 = shalt.err (!%p1255_p3)
}
 0x51d   :  { %781 = dma.vmem_to_hbm [thread:$0]  %s779_s11, 32, %s1410_s4, [#allocation4]  }
 0x51e   :  { %1263 = dma.done.wait [#allocation4], 32  }
 0x51f   :  { %1264 = vsyncadd [#allocation4], 4294967264 }
 0x520   :  { %785 = vsyncpa [#allocation3], 1 }
 0x521   :  { %786 = vsyncpa [#allocation6], 1 }
 0x522   :  { %787 = vsyncpa [#allocation4], 1 }

</bundles_post_ra>
